<compile_context>
chip_gen: v7x
topology: tpu7x:2x2x1
jax: 0.10.0
libtpu: 0.0.40
codegen_flags: <defaults>
</compile_context>

<pallas_src>
import jax
import jax.numpy as jnp
from jax import lax
from jax.experimental import pallas as pl
from jax.experimental.pallas import tpu as pltpu

EPS = 1e-5


def _simplenn_kernel(x_ref, packed_ref, o_ref):
    # x_ref:      (1, N)   -- batch on the 128-lane axis (lane-dense)
    # packed_ref: (64, 40) -- cols 0:32 = fc2.weight.T (64, 32)
    #                         col 32: w1, 33: gamma1, 34: beta1,
    #                         col 35 (rows 0:32): gamma2, 36: beta2, 37: w3,
    #                         col 38 (row 0): b3
    x = x_ref[...]                        # (1, N) float32
    p = packed_ref[...]                   # (64, 40) float32

    w2t  = p[:, 0:32]                     # (64, 32) == fc2.weight.T
    w1c  = p[:, 32:33]                    # (64, 1)
    g1c  = p[:, 33:34]
    be1c = p[:, 34:35]
    g2c  = p[:32, 35:36]                  # (32, 1)
    be2c = p[:32, 36:37]
    w3c  = p[:32, 37:38]
    b3   = p[0:1, 38:39]                  # (1, 1)

    # ---- fc1: degenerate K=1 contraction -> VPU broadcast (skip the MXU) ----
    # fc1 bias dropped: cancelled exactly by the batch-mean subtraction below.
    h = w1c * x                                               # (64, N)

    # ---- bn1 (batch statistics over the lane/batch axis, f32) + relu --------
    mu  = jnp.mean(h, axis=-1, keepdims=True)                 # (64, 1)
    ex2 = jnp.mean(h * h, axis=-1, keepdims=True)
    var = ex2 - mu * mu
    scale = g1c * lax.rsqrt(var + EPS)
    shift = be1c - mu * scale
    h = jnp.maximum(h * scale + shift, 0.0)                   # (64, N)

    # ---- fc2 on the MXU: transposed-LHS contraction (64,32)ᵀ·(64,N) -> (32,N)
    # fc2 bias dropped (cancelled by bn2).  HIGHEST precision keeps full f32.
    h = lax.dot_general(w2t, h, (((0,), (0,)), ((), ())),
                        precision=lax.Precision.HIGHEST,
                        preferred_element_type=jnp.float32)   # (32, N)

    # ---- bn2 + relu ----------------------------------------------------------
    mu  = jnp.mean(h, axis=-1, keepdims=True)                 # (32, 1)
    ex2 = jnp.mean(h * h, axis=-1, keepdims=True)
    var = ex2 - mu * mu
    scale = g2c * lax.rsqrt(var + EPS)
    shift = be2c - mu * scale
    h = jnp.maximum(h * scale + shift, 0.0)                   # (32, N)

    # ---- fc3: M=1 -> VPU mul + cross-sublane (XLU) reduce + bias -------------
    o_ref[...] = (jnp.sum(h * w3c, axis=0, keepdims=True) + b3).astype(o_ref.dtype)


def pack_params(params):
    """Build the single (64, 40) f32 parameter slab.  Call ONCE at init time
    (or whenever the weights change), never in the per-forward hot path."""
    small = jnp.zeros((64, 8), jnp.float32)
    small = small.at[:, 0].set(params["w1"][:, 0])        # fc1 weight (64,)
    small = small.at[:, 1].set(params["g1"])              # bn1 gamma
    small = small.at[:, 2].set(params["be1"])             # bn1 beta
    small = small.at[:32, 3].set(params["g2"])            # bn2 gamma
    small = small.at[:32, 4].set(params["be2"])           # bn2 beta
    small = small.at[:32, 5].set(params["w3"][0, :])      # fc3 weight (32,)
    small = small.at[0, 6].set(params["b3"][0])           # fc3 bias
    w2t = params["w2"].T.astype(jnp.float32)              # (64, 32)
    return jnp.concatenate([w2t, small], axis=1)          # (64, 40)


def simplenn_forward(x, packed):
    """x: (N,) or (N, 1) float32 scalar inputs.  `packed` is the precomputed
    pack_params() slab.  Returns (N, 1) float32 (SimpleNN forward with
    freshly-constructed, training-mode BatchNorm layers).

    Prefer passing x as a flat (N,) vector: the (N,)->(1,N) reshape is a
    bitcast, whereas (N,1)->(1,N) is a real relayout op."""
    n = x.shape[0]
    x_lane = x.reshape(1, n)            # lane-major: batch on the 128-lane axis

    vmem = pl.BlockSpec(memory_space=pltpu.MemorySpace.VMEM)
    out_t = pl.pallas_call(
        _simplenn_kernel,
        out_shape=jax.ShapeDtypeStruct((1, n), jnp.float32),
        in_specs=[vmem, vmem],
        out_specs=vmem,
        compiler_params=pltpu.CompilerParams(vmem_limit_bytes=8 * 1024 * 1024),
    )(x_lane, packed)
    return out_t.reshape(n, 1)


def init_params(key):
    """PyTorch default init: Linear weight/bias ~ U[-1/sqrt(fan_in), +1/sqrt(fan_in)];
    BN gamma=1, beta=0. Weights kept in PyTorch (out_features, in_features) layout."""
    ks = jax.random.split(key, 6)

    def lin(kw, kb, fan_in, fan_out):
        bound = 1.0 / jnp.sqrt(jnp.float32(fan_in))
        w = jax.random.uniform(kw, (fan_out, fan_in), jnp.float32, -bound, bound)
        b = jax.random.uniform(kb, (fan_out,), jnp.float32, -bound, bound)
        return w, b

    w1, b1 = lin(ks[0], ks[1], 1, 64)
    w2, b2 = lin(ks[2], ks[3], 64, 32)
    w3, b3 = lin(ks[4], ks[5], 32, 1)
    return dict(
        w1=w1, b1=b1,
        g1=jnp.ones((64,), jnp.float32), be1=jnp.zeros((64,), jnp.float32),
        w2=w2, b2=b2,
        g2=jnp.ones((32,), jnp.float32), be2=jnp.zeros((32,), jnp.float32),
        w3=w3, b3=b3,
    )


def _reference(x, p):
    """Plain-JAX reference faithful to the PyTorch module (with biases,
    two-pass batch-stat variance). x: (N, 1)."""
    h = x @ p["w1"].T + p["b1"]
    mu = h.mean(0, keepdims=True); var = ((h - mu) ** 2).mean(0, keepdims=True)
    h = jnp.maximum((h - mu) / jnp.sqrt(var + EPS) * p["g1"] + p["be1"], 0.0)
    h = h @ p["w2"].T + p["b2"]
    mu = h.mean(0, keepdims=True); var = ((h - mu) ** 2).mean(0, keepdims=True)
    h = jnp.maximum((h - mu) / jnp.sqrt(var + EPS) * p["g2"] + p["be2"], 0.0)
    return h @ p["w3"].T + p["b3"]


if __name__ == "__main__":
    key = jax.random.PRNGKey(0)
    kx, kp = jax.random.split(key)

    # Matches the module's usage: x = torch.randn(10, 1) -> 10 scalar inputs.
    # Generate them flat so the kernel path needs no (N,1)->(1,N) relayout.
    x_flat = jax.random.normal(kx, (10,), jnp.float32)
    params = init_params(kp)
    packed = pack_params(params)          # packed ONCE at init, reused per call

    fwd = jax.jit(simplenn_forward)
    out = fwd(x_flat, packed)
    jax.block_until_ready(out)

    ref = _reference(x_flat.reshape(10, 1), params)
    assert out.shape == (10, 1)
    assert jnp.allclose(out, ref, atol=2e-4, rtol=2e-4), (
        f"max abs diff {jnp.max(jnp.abs(out - ref))}")

    print("KERNEL_OK")
</pallas_src>

<mosaic_0001>
module attributes {stable_mosaic.version = 11 : i64} {
  func.func @_simplenn_kernel(%arg0: memref<1x10xf32, #tpu.memory_space<vmem>>, %arg1: memref<64x40xf32, #tpu.memory_space<vmem>>, %arg2: memref<1x10xf32, #tpu.memory_space<vmem>>) attributes {dimension_semantics = [], scalar_prefetch = 0 : i64, scratch_operands = 0 : i64, tpu.core_type = #tpu.core_type<tc>} {
    %c0 = arith.constant 0 : index
    %c0_0 = arith.constant 0 : index
    %0 = vector.load %arg0[%c0, %c0_0] : memref<1x10xf32, #tpu.memory_space<vmem>>, vector<1x10xf32>
    %c0_1 = arith.constant 0 : index
    %c0_2 = arith.constant 0 : index
    %1 = vector.load %arg1[%c0_1, %c0_2] : memref<64x40xf32, #tpu.memory_space<vmem>>, vector<64x40xf32>
    %2 = vector.extract_strided_slice %1 {offsets = [0, 0], sizes = [64, 32], strides = [1, 1]} : vector<64x40xf32> to vector<64x32xf32>
    %3 = vector.extract_strided_slice %1 {offsets = [0, 32], sizes = [64, 1], strides = [1, 1]} : vector<64x40xf32> to vector<64x1xf32>
    %4 = vector.extract_strided_slice %1 {offsets = [0, 33], sizes = [64, 1], strides = [1, 1]} : vector<64x40xf32> to vector<64x1xf32>
    %5 = vector.extract_strided_slice %1 {offsets = [0, 34], sizes = [64, 1], strides = [1, 1]} : vector<64x40xf32> to vector<64x1xf32>
    %6 = vector.extract_strided_slice %1 {offsets = [0, 35], sizes = [32, 1], strides = [1, 1]} : vector<64x40xf32> to vector<32x1xf32>
    %7 = vector.extract_strided_slice %1 {offsets = [0, 36], sizes = [32, 1], strides = [1, 1]} : vector<64x40xf32> to vector<32x1xf32>
    %8 = vector.extract_strided_slice %1 {offsets = [0, 37], sizes = [32, 1], strides = [1, 1]} : vector<64x40xf32> to vector<32x1xf32>
    %9 = vector.extract_strided_slice %1 {offsets = [0, 38], sizes = [1, 1], strides = [1, 1]} : vector<64x40xf32> to vector<1x1xf32>
    %10 = vector.broadcast %3 : vector<64x1xf32> to vector<64x10xf32>
    %11 = vector.broadcast %0 : vector<1x10xf32> to vector<64x10xf32>
    %12 = arith.mulf %10, %11 : vector<64x10xf32>
    %cst = arith.constant dense<0.000000e+00> : vector<64xf32>
    %13 = vector.multi_reduction <add>, %12, %cst [1] : vector<64x10xf32> to vector<64xf32>
    %14 = vector.shape_cast %13 : vector<64xf32> to vector<64x1xf32>
    %cst_3 = arith.constant 1.000000e+01 : f32
    %15 = vector.broadcast %cst_3 : f32 to vector<64x1xf32>
    %16 = arith.divf %14, %15 : vector<64x1xf32>
    %17 = arith.mulf %12, %12 : vector<64x10xf32>
    %cst_4 = arith.constant dense<0.000000e+00> : vector<64xf32>
    %18 = vector.multi_reduction <add>, %17, %cst_4 [1] : vector<64x10xf32> to vector<64xf32>
    %19 = vector.shape_cast %18 : vector<64xf32> to vector<64x1xf32>
    %cst_5 = arith.constant 1.000000e+01 : f32
    %20 = vector.broadcast %cst_5 : f32 to vector<64x1xf32>
    %21 = arith.divf %19, %20 : vector<64x1xf32>
    %22 = arith.mulf %16, %16 : vector<64x1xf32>
    %23 = arith.subf %21, %22 : vector<64x1xf32>
    %cst_6 = arith.constant 9.99999974E-6 : f32
    %24 = vector.broadcast %cst_6 : f32 to vector<64x1xf32>
    %25 = arith.addf %23, %24 : vector<64x1xf32>
    %26 = math.rsqrt %25 : vector<64x1xf32>
    %27 = arith.mulf %4, %26 : vector<64x1xf32>
    %28 = arith.mulf %16, %27 : vector<64x1xf32>
    %29 = arith.subf %5, %28 : vector<64x1xf32>
    %30 = vector.broadcast %27 : vector<64x1xf32> to vector<64x10xf32>
    %31 = arith.mulf %12, %30 : vector<64x10xf32>
    %32 = vector.broadcast %29 : vector<64x1xf32> to vector<64x10xf32>
    %33 = arith.addf %31, %32 : vector<64x10xf32>
    %cst_7 = arith.constant 0.000000e+00 : f32
    %34 = vector.broadcast %cst_7 : f32 to vector<64x10xf32>
    %35 = arith.maximumf %33, %34 : vector<64x10xf32>
    %cst_8 = arith.constant dense<0.000000e+00> : vector<32x10xf32>
    %36 = tpu.matmul %2, %35, %cst_8 {dimension_numbers = #tpu.dot_dimension_numbers<[0], [0], [1], [1], [0, 1, 1, 1], [], []>, precision = #tpu.contract_precision<fp32>} : vector<64x32xf32>, vector<64x10xf32>, vector<32x10xf32> -> vector<32x10xf32>
    %cst_9 = arith.constant dense<0.000000e+00> : vector<32xf32>
    %37 = vector.multi_reduction <add>, %36, %cst_9 [1] : vector<32x10xf32> to vector<32xf32>
    %38 = vector.shape_cast %37 : vector<32xf32> to vector<32x1xf32>
    %cst_10 = arith.constant 1.000000e+01 : f32
    %39 = vector.broadcast %cst_10 : f32 to vector<32x1xf32>
    %40 = arith.divf %38, %39 : vector<32x1xf32>
    %41 = arith.mulf %36, %36 : vector<32x10xf32>
    %cst_11 = arith.constant dense<0.000000e+00> : vector<32xf32>
    %42 = vector.multi_reduction <add>, %41, %cst_11 [1] : vector<32x10xf32> to vector<32xf32>
    %43 = vector.shape_cast %42 : vector<32xf32> to vector<32x1xf32>
    %cst_12 = arith.constant 1.000000e+01 : f32
    %44 = vector.broadcast %cst_12 : f32 to vector<32x1xf32>
    %45 = arith.divf %43, %44 : vector<32x1xf32>
    %46 = arith.mulf %40, %40 : vector<32x1xf32>
    %47 = arith.subf %45, %46 : vector<32x1xf32>
    %cst_13 = arith.constant 9.99999974E-6 : f32
    %48 = vector.broadcast %cst_13 : f32 to vector<32x1xf32>
    %49 = arith.addf %47, %48 : vector<32x1xf32>
    %50 = math.rsqrt %49 : vector<32x1xf32>
    %51 = arith.mulf %6, %50 : vector<32x1xf32>
    %52 = arith.mulf %40, %51 : vector<32x1xf32>
    %53 = arith.subf %7, %52 : vector<32x1xf32>
    %54 = vector.broadcast %51 : vector<32x1xf32> to vector<32x10xf32>
    %55 = arith.mulf %36, %54 : vector<32x10xf32>
    %56 = vector.broadcast %53 : vector<32x1xf32> to vector<32x10xf32>
    %57 = arith.addf %55, %56 : vector<32x10xf32>
    %cst_14 = arith.constant 0.000000e+00 : f32
    %58 = vector.broadcast %cst_14 : f32 to vector<32x10xf32>
    %59 = arith.maximumf %57, %58 : vector<32x10xf32>
    %60 = vector.broadcast %8 : vector<32x1xf32> to vector<32x10xf32>
    %61 = arith.mulf %59, %60 : vector<32x10xf32>
    %cst_15 = arith.constant dense<0.000000e+00> : vector<10xf32>
    %62 = vector.multi_reduction <add>, %61, %cst_15 [0] : vector<32x10xf32> to vector<10xf32>
    %63 = vector.shape_cast %62 : vector<10xf32> to vector<1x10xf32>
    %64 = vector.broadcast %9 : vector<1x1xf32> to vector<1x10xf32>
    %65 = arith.addf %63, %64 : vector<1x10xf32>
    %c0_16 = arith.constant 0 : index
    %c0_17 = arith.constant 0 : index
    %66 = vector.load %arg2[%c0_16, %c0_17] : memref<1x10xf32, #tpu.memory_space<vmem>>, vector<1x10xf32>
    tpu.vector_store %arg2[%c0_16, %c0_17], %65 {strides = array<i32>} : memref<1x10xf32, #tpu.memory_space<vmem>>, vector<1x10xf32>,
    return
  }
}

</mosaic_0001>

<bundles_post_ra>
// kernel: simplenn_forward.1
= control target key start
LH: loop header
LB: loop body
LE: loop exit
PB: predicated region body
PF: predicated region fallthrough
CT: control target
= control target key end

     0   :  { %v1633_v2 = vmov 32   ;;  %s2011_s0 = inlined_call_operand.vmem [shape: f32[1,10], index: 0, kind: input, shape index: {}]   ;;  %s2012_s1 = inlined_call_operand.vmem [shape: f32[64,40], index: 1, kind: input, shape index: {}]   ;;  %s2013_s2 = inlined_call_operand.hbm [shape: f32[1,10], index: 2, kind: output, shape index: {}]  }
   0x1   :  { %v1660_v0 = vld [vmem:[%s2012_s1 + $0x10] sm:$0xff]  ;;  %v1665_v1 = vld [vmem:[%s2012_s1] sm:$0xff]  ;;  %1570 = vset.pattern.permute.xlu1 %v1633_v2  ;;  %1569 = vset.pattern.permute.xlu0 %v1633_v2  ;;  %v1672_v3 = vld [vmem:[%s2012_s1 + $0x18] sm:$0xff] }
   0x2   :  { %33 = vperm.xlu1 %1570, %v1660_v0   ;;  %23 = vperm.xlu0 %1569, %v1665_v1   ;;  %v1677_v4 = vld [vmem:[%s2012_s1 + $0x8] sm:$0xff] }
   0x3   :  { %7 = vsyncpa [#allocation3], 0  ;;  %v1684_v5 = vld [vmem:[%s2012_s1 + $0x28] sm:$0xff]  ;;  %v1689_v6 = vld [vmem:[%s2012_s1 + $0x20] sm:$0xff]  ;;  %vm75_vm0 = vcmask 80896   ;;  %v1634_v50 = vmov 33  }
   0x4   :  { %v1696_v7 = vld [vmem:[%s2012_s1 + $0x38] sm:$0xff]  ;;  %v1701_v8 = vld [vmem:[%s2012_s1 + $0x30] sm:$0xff]  ;;  %v1238_v9 = vld [vmem:[%s2011_s0] ss:$0 sm:$0xff]  ;;  %s1635_s0 = smov 1   ;;  %vm373_vm1 = vcmask 523264  }
   0x5   :  { %vm1222_vm2 = vcmask 73728  }
   0x6   :  { %38 = vperm.xlu1 %1570, %v1672_v3   ;;  %28 = vperm.xlu0 %1569, %v1677_v4  }
   0xa   :  { %48 = vperm.xlu1 %1570, %v1684_v5   ;;  %43 = vperm.xlu0 %1569, %v1689_v6  }
   0xe   :  { %58 = vperm.xlu1 %1570, %v1696_v7   ;;  %53 = vperm.xlu0 %1569, %v1701_v8  }
  0x12   :  { %1571 = vset.pattern.permute.xlu0 %v1634_v50  ;;  %1572 = vset.pattern.permute.xlu1 %v1634_v50 }
  0x81   :  { %v34_v10 = vpop.permute.xlu1 %33  ;;  %v24_v11 = vpop.permute.xlu0 %23 }
  0x82   :  { %v1708_v12 = vmul.f32 %v1238_v9, %v24_v11  ;;  %v1716_v18 = vmul.f32 %v1238_v9, %v34_v10 }
  0x84   :  { %v76_v13 = vsel %vm75_vm0, %v1708_v12, 0.0  ;;  %v82_v25 = vsel %vm75_vm0, %v1716_v18, 0.0  ;;  %v109_v33 = vmul.f32 %v1708_v12, %v1708_v12  ;;  %v111_v36 = vmul.f32 %v1716_v18, %v1716_v18 }
  0x85   :  { %v39_v14 = vpop.permute.xlu1 %38  ;;  %v29_v15 = vpop.permute.xlu0 %28  ;;  %77 = vadd.xlane.f32.xlu0 %v76_v13 }
  0x86   :  { %v1712_v16 = vmul.f32 %v1238_v9, %v39_v14  ;;  %v1714_v17 = vmul.f32 %v1238_v9, %v29_v15  ;;  %v117_v35 = vsel %vm75_vm0, %v109_v33, 0.0  ;;  %v123_v38 = vsel %vm75_vm0, %v111_v36, 0.0 }
  0x88   :  { %v79_v19 = vsel %vm75_vm0, %v1714_v17, 0.0  ;;  %v85_v20 = vsel %vm75_vm0, %v1712_v16, 0.0  ;;  %v110_v37 = vmul.f32 %v1714_v17, %v1714_v17  ;;  %v112_v41 = vmul.f32 %v1712_v16, %v1712_v16 }
  0x89   :  { %v49_v21 = vpop.permute.xlu1 %48  ;;  %v44_v22 = vpop.permute.xlu0 %43  ;;  %80 = vadd.xlane.f32.xlu1 %v79_v19  ;;  %86 = vadd.xlane.f32.xlu0 %v85_v20 }
  0x8a   :  { %v1722_v23 = vmul.f32 %v1238_v9, %v49_v21  ;;  %v1724_v24 = vmul.f32 %v1238_v9, %v44_v22  ;;  %v120_v39 = vsel %vm75_vm0, %v110_v37, 0.0  ;;  %v126_v43 = vsel %vm75_vm0, %v112_v41, 0.0 }
  0x8c   :  { %v91_v26 = vsel %vm75_vm0, %v1722_v23, 0.0  ;;  %v88_v31 = vsel %vm75_vm0, %v1724_v24, 0.0  ;;  %v113_v40 = vmul.f32 %v1724_v24, %v1724_v24  ;;  %v114_v45 = vmul.f32 %v1722_v23, %v1722_v23 }
  0x8d   :  { %v59_v27 = vpop.permute.xlu1 %58  ;;  %v54_v28 = vpop.permute.xlu0 %53  ;;  %83 = vadd.xlane.f32.xlu1 %v82_v25  ;;  %92 = vadd.xlane.f32.xlu0 %v91_v26 }
  0x8e   :  { %v1730_v29 = vmul.f32 %v1238_v9, %v59_v27  ;;  %v1732_v30 = vmul.f32 %v1238_v9, %v54_v28  ;;  %v129_v42 = vsel %vm75_vm0, %v113_v40, 0.0  ;;  %v132_v47 = vsel %vm75_vm0, %v114_v45, 0.0 }
  0x90   :  { %v97_v32 = vsel %vm75_vm0, %v1730_v29, 0.0  ;;  %v94_v34 = vsel %vm75_vm0, %v1732_v30, 0.0  ;;  %v115_v44 = vmul.f32 %v1732_v30, %v1732_v30  ;;  %v116_v48 = vmul.f32 %v1730_v29, %v1730_v29 }
  0x91   :  { %89 = vadd.xlane.f32.xlu1 %v88_v31  ;;  %98 = vadd.xlane.f32.xlu0 %v97_v32 }
  0x92   :  { %v135_v46 = vsel %vm75_vm0, %v115_v44, 0.0  ;;  %v138_v49 = vsel %vm75_vm0, %v116_v48, 0.0 }
  0x95   :  { %95 = vadd.xlane.f32.xlu1 %v94_v34  ;;  %118 = vadd.xlane.f32.xlu0 %v117_v35 }
  0x99   :  { %124 = vadd.xlane.f32.xlu1 %v123_v38  ;;  %121 = vadd.xlane.f32.xlu0 %v120_v39 }
  0x9d   :  { %130 = vadd.xlane.f32.xlu1 %v129_v42  ;;  %127 = vadd.xlane.f32.xlu0 %v126_v43 }
  0xa1   :  { %136 = vadd.xlane.f32.xlu1 %v135_v46  ;;  %133 = vadd.xlane.f32.xlu0 %v132_v47 }
  0xa5   :  { %139 = vadd.xlane.f32.xlu0 %v138_v49 }
 0x112   :  { %v78_v51 = vpop.xlane.xlu0 %77 }
 0x113   :  { %v101_v58 = vmul.f32 0.1, %v78_v51 }
 0x115   :  { %v149_v62 = vmul.f32 %v101_v58, %v101_v58 }
 0x116   :  { %v81_v52 = vpop.xlane.xlu1 %80  ;;  %v87_v53 = vpop.xlane.xlu0 %86 }
 0x117   :  { %v1764_v59 = vmul.f32 0.1, %v81_v52  ;;  %v104_v22 = vmul.f32 0.1, %v87_v53 }
 0x119   :  { %v150_v10 = vmul.f32 %v1764_v59, %v1764_v59  ;;  %v152_v37 = vmul.f32 %v104_v22, %v104_v22 }
 0x11a   :  { %v84_v54 = vpop.xlane.xlu1 %83  ;;  %v93_v55 = vpop.xlane.xlu0 %92 }
 0x11b   :  { %v103_v63 = vmul.f32 0.1, %v84_v54  ;;  %v1770_v27 = vmul.f32 0.1, %v93_v55 }
 0x11d   :  { %v151_v15 = vmul.f32 %v103_v63, %v103_v63  ;;  %v154_v40 = vmul.f32 %v1770_v27, %v1770_v27 }
 0x11e   :  { %v90_v56 = vpop.xlane.xlu1 %89  ;;  %v99_v57 = vpop.xlane.xlu0 %98 }
 0x11f   :  { %v1768_v11 = vmul.f32 0.1, %v90_v56  ;;  %v108_v41 = vmul.f32 0.1, %v99_v57 }
 0x121   :  { %v153_v33 = vmul.f32 %v1768_v11, %v1768_v11  ;;  %v156_v54 = vmul.f32 %v108_v41, %v108_v41 }
 0x122   :  { %v96_v60 = vpop.xlane.xlu1 %95  ;;  %v119_v61 = vpop.xlane.xlu0 %118 }
 0x123   :  { %v141_v2 = vmul.f32 0.1, %v119_v61  ;;  %v107_v28 = vmul.f32 0.1, %v96_v60 }
 0x125   :  { %v157_v9 = vsub.f32 %v141_v2, %v149_v62  ;;  %v155_v45 = vmul.f32 %v107_v28, %v107_v28 }
 0x126   :  { %v125_v13 = vpop.xlane.xlu1 %124  ;;  %v122_v14 = vpop.xlane.xlu0 %121 }
 0x127   :  { %v165_v19 = vadd.f32 1e-05, %v157_v9  ;;  %v143_v20 = vmul.f32 0.1, %v125_v13  ;;  %v142_v21 = vmul.f32 0.1, %v122_v14 }
 0x129   :  { %1582 = vrsqrt.f32 %v165_v19  ;;  %v159_v25 = vsub.f32 %v143_v20, %v151_v15  ;;  %v158_v26 = vsub.f32 %v142_v21, %v150_v10 }
 0x12a   :  { %v131_v31 = vpop.xlane.xlu1 %130  ;;  %v128_v32 = vpop.xlane.xlu0 %127 }
 0x12b   :  { %v167_v34 = vadd.f32 1e-05, %v159_v25  ;;  %v166_v35 = vadd.f32 1e-05, %v158_v26  ;;  %v145_v36 = vmul.f32 0.1, %v131_v31 }
 0x12c   :  { %v144_v38 = vmul.f32 0.1, %v128_v32 }
 0x12d   :  { %1584 = vrsqrt.f32 %v167_v34  ;;  %v161_v39 = vsub.f32 %v145_v36, %v153_v33 }
 0x12e   :  { %1586 = vrsqrt.f32 %v166_v35  ;;  %v160_v42 = vsub.f32 %v144_v38, %v152_v37  ;;  %v137_v43 = vpop.xlane.xlu1 %136  ;;  %v134_v44 = vpop.xlane.xlu0 %133 }
 0x12f   :  { %v169_v46 = vadd.f32 1e-05, %v161_v39  ;;  %v147_v47 = vmul.f32 0.1, %v137_v43  ;;  %v146_v48 = vmul.f32 0.1, %v134_v44 }
 0x130   :  { %v168_v49 = vadd.f32 1e-05, %v160_v42 }
 0x131   :  { %1588 = vrsqrt.f32 %v169_v46  ;;  %v163_v50 = vsub.f32 %v147_v47, %v155_v45  ;;  %v162_v51 = vsub.f32 %v146_v48, %v154_v40 }
 0x132   :  { %1590 = vrsqrt.f32 %v168_v49  ;;  %v140_v52 = vpop.xlane.xlu0 %139 }
 0x133   :  { %v1583_v53 = vpop.eup %1582  ;;  %v171_v55 = vadd.f32 1e-05, %v163_v50  ;;  %v170_v56 = vadd.f32 1e-05, %v162_v51  ;;  %v148_v60 = vmul.f32 0.1, %v140_v52 }
 0x134   :  { %v181_v57 = vmul.f32 %v1583_v53, %v1665_v1 }
 0x135   :  { %1592 = vrsqrt.f32 %v171_v55  ;;  %v164_v61 = vsub.f32 %v148_v60, %v156_v54 }
 0x136   :  { %1594 = vrsqrt.f32 %v170_v56  ;;  %v189_v62 = vmul.f32 %v181_v57, %v101_v58 }
 0x137   :  { %v1585_v2 = vpop.eup %1584  ;;  %v172_v9 = vadd.f32 1e-05, %v164_v61 }
 0x138   :  { %v1587_v10 = vpop.eup %1586  ;;  %205 = vrot.lane.b32.xlu1 %v189_v62, %s1635_s0  ;;  %v183_v13 = vmul.f32 %v1585_v2, %v1660_v0 }
 0x139   :  { %1596 = vrsqrt.f32 %v172_v9  ;;  %v182_v14 = vmul.f32 %v1587_v10, %v1677_v4 }
 0x13a   :  { %v191_v15 = vmul.f32 %v183_v13, %v103_v63 }
 0x13b   :  { %v1589_v19 = vpop.eup %1588  ;;  %v190_v20 = vmul.f32 %v182_v14, %v1764_v59 }
 0x13c   :  { %v1591_v21 = vpop.eup %1590  ;;  %209 = vrot.lane.b32.xlu1 %v191_v15, %s1635_s0  ;;  %v185_v58 = vmul.f32 %v1589_v19, %v1689_v6 }
 0x13d   :  { %207 = vrot.lane.b32.xlu0 %v190_v20, %s1635_s0  ;;  %v184_v25 = vmul.f32 %v1591_v21, %v1672_v3 }
 0x13e   :  { %v193_v26 = vmul.f32 %v185_v58, %v1768_v11 }
 0x13f   :  { %v1593_v31 = vpop.eup %1592  ;;  %v192_v32 = vmul.f32 %v184_v25, %v104_v22  ;;  %v1636_v22 = vmov 34  }
 0x140   :  { %v1595_v33 = vpop.eup %1594  ;;  %v187_v34 = vmul.f32 %v1593_v31, %v1701_v8 }
 0x141   :  { %213 = vrot.lane.b32.xlu0 %v193_v26, %s1635_s0  ;;  %211 = vrot.lane.b32.xlu1 %v192_v32, %s1635_s0  ;;  %v186_v59 = vmul.f32 %v1595_v33, %v1684_v5 }
 0x142   :  { %v195_v63 = vmul.f32 %v187_v34, %v107_v28 }
 0x143   :  { %v1597_v35 = vpop.eup %1596  ;;  %v194_v36 = vmul.f32 %v186_v59, %v1770_v27 }
 0x144   :  { %v188_v37 = vmul.f32 %v1597_v35, %v1696_v7 }
 0x145   :  { %217 = vrot.lane.b32.xlu0 %v195_v63, %s1635_s0  ;;  %215 = vrot.lane.b32.xlu1 %v194_v36, %s1635_s0 }
 0x146   :  { %v196_v11 = vmul.f32 %v188_v37, %v108_v41 }
 0x149   :  { %239 = vperm.xlu0 %1571, %v181_v57   ;;  %219 = vrot.lane.b32.xlu1 %v196_v11, %s1635_s0 }
 0x14d   :  { %259 = vperm.xlu0 %1571, %v185_v58   ;;  %244 = vperm.xlu1 %1572, %v182_v14  }
 0x151   :  { %249 = vperm.xlu1 %1572, %v183_v13   ;;  %1574 = vset.pattern.permute.xlu0 %v1636_v22 }
 0x155   :  { %254 = vperm.xlu1 %1572, %v184_v25  }
 0x159   :  { %264 = vperm.xlu1 %1572, %v186_v59  }
 0x15d   :  { %269 = vperm.xlu1 %1572, %v187_v34  }
 0x161   :  { %274 = vperm.xlu1 %1572, %v188_v37  }
 0x165   :  { %1573 = vset.pattern.permute.xlu1 %v1636_v22 }
 0x1aa   :  { %v206_v27 = vpop.permute.xlu1 %205 }
 0x1ab   :  { %v229_v28 = vsub.f32 %v1665_v1, %v206_v27 }
 0x1ad   :  { %287 = vperm.xlu1 %1573, %v229_v28  }
 0x1ae   :  { %v210_v38 = vpop.permute.xlu1 %209 }
 0x1af   :  { %v208_v39 = vpop.permute.xlu0 %207  ;;  %v231_v43 = vsub.f32 %v1660_v0, %v210_v38 }
 0x1b0   :  { %v230_v40 = vsub.f32 %v1677_v4, %v208_v39 }
 0x1b2   :  { %292 = vperm.xlu0 %1574, %v230_v40  }
 0x1b3   :  { %v212_v41 = vpop.permute.xlu1 %211  ;;  %v214_v42 = vpop.permute.xlu0 %213 }
 0x1b4   :  { %v232_v44 = vsub.f32 %v1672_v3, %v212_v41  ;;  %v233_v46 = vsub.f32 %v1689_v6, %v214_v42 }
 0x1b6   :  { %302 = vperm.xlu1 %1573, %v232_v44   ;;  %297 = vperm.xlu0 %1574, %v231_v43  }
 0x1b7   :  { %v216_v45 = vpop.permute.xlu1 %215  ;;  %v218_v48 = vpop.permute.xlu0 %217 }
 0x1b8   :  { %v234_v47 = vsub.f32 %v1684_v5, %v216_v45  ;;  %v235_v50 = vsub.f32 %v1701_v8, %v218_v48 }
 0x1ba   :  { %312 = vperm.xlu0 %1574, %v234_v47   ;;  %307 = vperm.xlu1 %1573, %v233_v46  }
 0x1bb   :  { %v220_v49 = vpop.permute.xlu1 %219 }
 0x1bc   :  { %v236_v51 = vsub.f32 %v1696_v7, %v220_v49 }
 0x1be   :  { %322 = vperm.xlu1 %1573, %v236_v51   ;;  %317 = vperm.xlu0 %1574, %v235_v50  }
 0x1c8   :  { %v240_v60 = vpop.permute.xlu0 %239 }
 0x1c9   :  { %v277_v61 = vmul.f32 %v240_v60, %v1708_v12 }
 0x1cc   :  { %v245_v52 = vpop.permute.xlu1 %244  ;;  %v260_v2 = vpop.permute.xlu0 %259 }
 0x1cd   :  { %v281_v12 = vmul.f32 %v260_v2, %v1724_v24 }
 0x1d0   :  { %v250_v53 = vpop.permute.xlu1 %249 }
 0x1d4   :  { %v255_v54 = vpop.permute.xlu1 %254 }
 0x1d8   :  { %v265_v55 = vpop.permute.xlu1 %264 }
 0x1d9   :  { %v282_v33 = vmul.f32 %v265_v55, %v1722_v23 }
 0x1dc   :  { %341 = vxpose.xlu0.b32.start [1/8] (short) (narrow) %v1665_v1, 32  ;;  %v270_v56 = vpop.permute.xlu1 %269 }
 0x1dd   :  { %v283_v23 = vmul.f32 %v270_v56, %v1732_v30 }
 0x1e0   :  { %342 = vxpose.xlu0.b32.cont [2/8] (short) (narrow) %v1677_v4, 32  ;;  %v275_v57 = vpop.permute.xlu1 %274 }
 0x1e1   :  { %v284_v37 = vmul.f32 %v275_v57, %v1730_v29 }
 0x1e4   :  { %343 = vxpose.xlu0.b32.cont [3/8] (short) (narrow) %v1660_v0, 32 }
 0x1e8   :  { %344 = vxpose.xlu0.b32.cont [4/8] (short) (narrow) %v1672_v3, 32 }
 0x1ec   :  { %345 = vxpose.xlu0.b32.cont [5/8] (short) (narrow) %v1689_v6, 32  ;;  %v278_v6 = vmul.f32 %v245_v52, %v1714_v17 }
 0x1f0   :  { %346 = vxpose.xlu0.b32.cont [6/8] (short) (narrow) %v1684_v5, 32 }
 0x1f4   :  { %347 = vxpose.xlu0.b32.cont [7/8] (short) (narrow) %v1701_v8, 32  ;;  %v279_v8 = vmul.f32 %v250_v53, %v1716_v18 }
 0x1f8   :  { %348 = vxpose.xlu0.b32.end [8/8] (short) (narrow) %v1696_v7, 32  ;;  %v280_v7 = vmul.f32 %v255_v54, %v1712_v16 }
 0x22c   :  { %v288_v62 = vpop.permute.xlu1 %287 }
 0x22d   :  { %v325_v9 = vadd.f32 %v288_v62, %v277_v61 }
 0x22f   :  { %v333_v10 = vmax.f32 %v325_v9, 0.0 }
 0x231   :  { %v293_v5 = vpop.permute.xlu0 %292  ;;  %v387_v15 = vand.u32 4294901760, %v333_v10 }
 0x232   :  { %v326_v13 = vadd.f32 %v293_v5, %v278_v6 }
 0x233   :  { %v1821_v18 = vsub.f32 %v333_v10, %v387_v15 }
 0x234   :  { %v334_v14 = vmax.f32 %v326_v13, 0.0 }
 0x235   :  { %v303_v19 = vpop.permute.xlu1 %302  ;;  %v298_v20 = vpop.permute.xlu0 %297  ;;  %v502_v27 = vand.u32 4294901760, %v1821_v18 }
 0x236   :  { %v390_v21 = vand.u32 4294901760, %v334_v14  ;;  %v328_v58 = vadd.f32 %v303_v19, %v280_v7  ;;  %v327_v25 = vadd.f32 %v298_v20, %v279_v8 }
 0x237   :  { %v503_v46 = vsub.f32 %v1821_v18, %v502_v27 }
 0x238   :  { %v1816_v26 = vpack.c.bf16 %v390_v21, %v387_v15  ;;  %v1818_v31 = vsub.f32 %v334_v14, %v390_v21  ;;  %v336_v17 = vmax.f32 %v328_v58, 0.0  ;;  %v335_v32 = vmax.f32 %v327_v25, 0.0 }
 0x239   :  { %v308_v16 = vpop.permute.xlu1 %307  ;;  %v313_v34 = vpop.permute.xlu0 %312  ;;  %v504_v51 = vand.u32 4294901760, %v503_v46 }
 0x23a   :  { %v396_v59 = vand.u32 4294901760, %v336_v17  ;;  %v393_v63 = vand.u32 4294901760, %v335_v32  ;;  %v329_v35 = vadd.f32 %v308_v16, %v281_v12  ;;  %1444 = vmatprep.subr.bf16.mxu1 %v1816_v26  ;;  %1492 = vmatprep.subr.bf16.mxu0 %v1816_v26  ;;  %v509_v24 = vand.u32 4294901760, %v1818_v31 }
 0x23b   :  { %v330_v36 = vadd.f32 %v313_v34, %v282_v33  ;;  %1446 = vmatpush3.bf16.msra.mxu1 %v1816_v26  ;;  %1494 = vmatpush3.bf16.msra.mxu0 %v1816_v26 }
 0x23c   :  { %v1830_v11 = vpack.c.bf16 %v396_v59, %v393_v63  ;;  %v337_v22 = vmax.f32 %v329_v35, 0.0  ;;  %v510_v29 = vsub.f32 %v1818_v31, %v509_v24  ;;  %v1507_v53 = vpack.c.bf16 %v509_v24, %v502_v27 }
 0x23d   :  { %v338_v28 = vmax.f32 %v330_v36, 0.0  ;;  %v323_v38 = vpop.permute.xlu1 %322  ;;  %v318_v39 = vpop.permute.xlu0 %317  ;;  %v1854_v54 = vsub.f32 %v336_v17, %v396_v59  ;;  %v1856_v55 = vsub.f32 %v335_v32, %v393_v63 }
 0x23e   :  { %v399_v40 = vand.u32 4294901760, %v337_v22  ;;  %v332_v41 = vadd.f32 %v323_v38, %v284_v37  ;;  %v331_v42 = vadd.f32 %v318_v39, %v283_v23  ;;  %1448 = vmatprep.subr.bf16.mxu1 %v1830_v11  ;;  %1496 = vmatprep.subr.bf16.mxu0 %v1830_v11  ;;  %v511_v49 = vand.u32 4294901760, %v510_v29 }
 0x23f   :  { %v402_v43 = vand.u32 4294901760, %v338_v28  ;;  %1450 = vmatpush3.bf16.msra.mxu1 %v1830_v11  ;;  %1498 = vmatpush3.bf16.msra.mxu0 %v1830_v11  ;;  %v516_v62 = vand.u32 4294901760, %v1856_v55  ;;  %v523_v2 = vand.u32 4294901760, %v1854_v54 }
 0x240   :  { %v340_v30 = vmax.f32 %v332_v41, 0.0  ;;  %v339_v44 = vmax.f32 %v331_v42, 0.0  ;;  %v1849_v52 = vpack.c.bf16 %v511_v49, %v504_v51  ;;  %v1861_v61 = vsub.f32 %v337_v22, %v399_v40 }
 0x241   :  { %v1838_v45 = vpack.c.bf16 %v402_v43, %v399_v40  ;;  %v1865_v9 = vsub.f32 %v338_v28, %v402_v43  ;;  %v517_v14 = vsub.f32 %v1856_v55, %v516_v62  ;;  %v524_v15 = vsub.f32 %v1854_v54, %v523_v2 }
 0x242   :  { %v408_v47 = vand.u32 4294901760, %v340_v30  ;;  %v405_v48 = vand.u32 4294901760, %v339_v44  ;;  %v530_v19 = vand.u32 4294901760, %v1861_v61  ;;  %v1511_v34 = vpack.c.bf16 %v523_v2, %v516_v62 }
 0x243   :  { %1452 = vmatprep.subr.bf16.mxu1 %v1838_v45  ;;  %1500 = vmatprep.subr.bf16.mxu0 %v1838_v45  ;;  %v537_v12 = vand.u32 4294901760, %v1865_v9  ;;  %v518_v59 = vand.u32 4294901760, %v517_v14  ;;  %v525_v63 = vand.u32 4294901760, %v524_v15 }
 0x244   :  { %v1843_v50 = vpack.c.bf16 %v408_v47, %v405_v48  ;;  %1454 = vmatpush3.bf16.msra.mxu1 %v1838_v45  ;;  %1502 = vmatpush3.bf16.msra.mxu0 %v1838_v45  ;;  %v1874_v7 = vsub.f32 %v339_v44, %v405_v48  ;;  %v1879_v20 = vsub.f32 %v340_v30, %v408_v47 }
 0x245   :  { %v531_v35 = vsub.f32 %v1861_v61, %v530_v19  ;;  %v538_v22 = vsub.f32 %v1865_v9, %v537_v12  ;;  %v1463_v41 = vpack.c.bf16 %v525_v63, %v518_v59  ;;  %v1515_v42 = vpack.c.bf16 %v537_v12, %v530_v19 }
 0x246   :  { %1456 = vmatprep.subr.bf16.mxu1 %v1843_v50  ;;  %1504 = vmatprep.subr.bf16.mxu0 %v1843_v50  ;;  %v544_v24 = vand.u32 4294901760, %v1874_v7  ;;  %v551_v27 = vand.u32 4294901760, %v1879_v20 }
 0x247   :  { %v532_v43 = vand.u32 4294901760, %v531_v35  ;;  %v539_v46 = vand.u32 4294901760, %v538_v22 }
 0x248   :  { %1458 = vmatpush3.bf16.msra.mxu1 %v1843_v50  ;;  %1506 = vmatpush3.bf16.msra.mxu0 %v1843_v50  ;;  %v545_v29 = vsub.f32 %v1874_v7, %v544_v24  ;;  %v552_v47 = vsub.f32 %v1879_v20, %v551_v27  ;;  %v1519_v51 = vpack.c.bf16 %v551_v27, %v544_v24 }
 0x249   :  { %1460 = vmatprep.subr.bf16.mxu1 %v1849_v52  ;;  %1508 = vmatprep.subr.bf16.mxu0 %v1507_v53 }
 0x24a   :  { %v553_v62 = vand.u32 4294901760, %v552_v47 }
 0x25c   :  { %v357_v56 = vpop.trf.xlu0 }
 0x25d   :  { %v375_v60 = vsel %vm373_vm1, %v357_v56, 0 }
 0x25e   :  { %v1859_v57 = vand.u32 4294901760, %v375_v60 }
 0x260   :  { %v1868_v6 = vsub.f32 %v375_v60, %v1859_v57  ;;  %v358_v10 = vpop.trf.xlu0  ;;  %v546_v60 = vand.u32 4294901760, %v545_v29  ;;  %v1638_v29 = vmov 36  }
 0x261   :  { %v378_v5 = vsel %vm373_vm1, %v358_v10, 0  ;;  %v1475_v10 = vpack.c.bf16 %v1818_v31, %v1821_v18  ;;  %v1487_v31 = vpack.c.bf16 %v1879_v20, %v1874_v7  ;;  %1576 = vset.pattern.permute.xlu0 %v1638_v29 }
 0x262   :  { %v1871_v13 = vand.u32 4294901760, %v378_v5  ;;  %v461_v8 = vand.u32 4294901760, %v1868_v6 }
 0x264   :  { %v1882_v21 = vsub.f32 %v378_v5, %v1871_v13  ;;  %1393 = vmatprep.mubr.f32.mxu0 %v461_v8  ;;  %v359_v58 = vpop.trf.xlu0  ;;  %v462_v25 = vsub.f32 %v1868_v6, %v461_v8  ;;  %v1479_v5 = vpack.c.bf16 %v1854_v54, %v1856_v55 }
 0x265   :  { %v381_v17 = vsel %vm373_vm1, %v359_v58, 0 }
 0x266   :  { %v1887_v32 = vand.u32 4294901760, %v381_v17  ;;  %v463_v33 = vand.u32 4294901760, %v462_v25  ;;  %v471_v16 = vand.u32 4294901760, %v1882_v21 }
 0x268   :  { %v1893_v36 = vsub.f32 %v381_v17, %v1887_v32  ;;  %1327 = vmatprep.mubr.f32.mxu1 %v463_v33  ;;  %1394 = vmatmul.mubr.f32.vlgmr.msra.gmra.mrb[0].mxu0 %v471_v16  ;;  %v360_v23 = vpop.trf.xlu0  ;;  %v472_v37 = vsub.f32 %v1882_v21, %v471_v16  ;;  %v1637_v16 = vmov 35  }
 0x269   :  { %1510 = vmatpush3.bf16.msra.mxu0 %v1507_v53  ;;  %v384_v28 = vsel %vm373_vm1, %v360_v23, 0  ;;  %v1467_v53 = vpack.c.bf16 %v539_v46, %v532_v43  ;;  %1575 = vset.pattern.permute.xlu1 %v1637_v16 }
 0x26a   :  { %v1899_v38 = vand.u32 4294901760, %v384_v28  ;;  %1512 = vmatprep.subr.bf16.mxu0 %v1511_v34  ;;  %v473_v39 = vand.u32 4294901760, %v472_v37  ;;  %v481_v40 = vand.u32 4294901760, %v1893_v36 }
 0x26c   :  { %v1904_v30 = vsub.f32 %v384_v28, %v1899_v38  ;;  %1328 = vmatmul.mubr.f32.vlgmr.msra.gmra.mrb[0].mxu1 %v473_v39  ;;  %1396 = vmatprep.mubr.f32.mxu0 %v481_v40  ;;  %v482_v44 = vsub.f32 %v1893_v36, %v481_v40 }
 0x26d   :  { %1462 = vmatpush3.bf16.msra.mxu1 %v1849_v52  ;;  %1514 = vmatpush3.bf16.msra.mxu0 %v1511_v34  ;;  %v1471_v52 = vpack.c.bf16 %v553_v62, %v546_v60 }
 0x26e   :  { %1464 = vmatprep.subr.bf16.mxu1 %v1463_v41  ;;  %1516 = vmatprep.subr.bf16.mxu0 %v1515_v42  ;;  %v483_v48 = vand.u32 4294901760, %v482_v44  ;;  %v491_v49 = vand.u32 4294901760, %v1904_v30 }
 0x270   :  { %1330 = vmatprep.mubr.f32.mxu1 %v483_v48  ;;  %1397 = vmatmul.mubr.f32.gmra.mrb[2].mxu0 %v491_v49  ;;  %v492_v56 = vsub.f32 %v1904_v30, %v491_v49 }
 0x271   :  { %1466 = vmatpush3.bf16.msra.mxu1 %v1463_v41  ;;  %1518 = vmatpush3.bf16.msra.mxu0 %v1515_v42 }
 0x272   :  { %1468 = vmatprep.subr.bf16.mxu1 %v1467_v53  ;;  %1520 = vmatprep.subr.bf16.mxu0 %v1519_v51  ;;  %v493_v2 = vand.u32 4294901760, %v492_v56 }
 0x273   :  { %1415 = vmatprep.mubr.f32.mxu0 %v1859_v57 }
 0x274   :  { %1331 = vmatmul.mubr.f32.gmra.mrb[2].mxu1 %v493_v2 }
 0x275   :  { %1470 = vmatpush3.bf16.msra.mxu1 %v1467_v53  ;;  %1522 = vmatpush3.bf16.msra.mxu0 %v1519_v51 }
 0x276   :  { %1472 = vmatprep.subr.bf16.mxu1 %v1471_v52  ;;  %1349 = vmatprep.mubr.f32.mxu1 %v1859_v57 }
 0x277   :  { %1524 = vmatprep.subr.bf16.mxu0 %v1816_v26 }
 0x278   :  { %1416 = vmatmul.mubr.f32.vlgmr.msra.gmra.mrb[0].mxu0 %v1871_v13 }
 0x279   :  { %1474 = vmatpush3.bf16.msra.mxu1 %v1471_v52  ;;  %1418 = vmatprep.mubr.f32.mxu0 %v1887_v32 }
 0x27a   :  { %1526 = vmatpush3.bf16.msra.mxu0 %v1816_v26  ;;  %1476 = vmatprep.subr.bf16.mxu1 %v1475_v10  ;;  %v1483_v26 = vpack.c.bf16 %v1865_v9, %v1861_v61 }
 0x27b   :  { %1528 = vmatprep.subr.bf16.mxu0 %v1830_v11 }
 0x27c   :  { %1350 = vmatmul.mubr.f32.vlgmr.msra.gmra.mrb[0].mxu1 %v1871_v13  ;;  %1419 = vmatmul.mubr.f32.gmra.mrb[2].mxu0 %v1899_v38 }
 0x27d   :  { %1352 = vmatprep.mubr.f32.mxu1 %v1887_v32  ;;  %1478 = vmatpush3.bf16.msra.mxu1 %v1475_v10 }
 0x27e   :  { %1530 = vmatpush3.bf16.msra.mxu0 %v1830_v11  ;;  %1437 = vmatprep.mubr.f32.mxu0 %v1859_v57 }
 0x27f   :  { %1480 = vmatprep.subr.bf16.mxu1 %v1479_v5  ;;  %1532 = vmatprep.subr.bf16.mxu0 %v1838_v45 }
 0x280   :  { %1353 = vmatmul.mubr.f32.gmra.mrb[2].mxu1 %v1899_v38 }
 0x281   :  { %1482 = vmatpush3.bf16.msra.mxu1 %v1479_v5  ;;  %1371 = vmatprep.mubr.f32.mxu1 %v1868_v6 }
 0x282   :  { %1534 = vmatpush3.bf16.msra.mxu0 %v1838_v45  ;;  %1484 = vmatprep.subr.bf16.mxu1 %v1483_v26 }
 0x283   :  { %1536 = vmatprep.subr.bf16.mxu0 %v1843_v50 }
 0x285   :  { %1486 = vmatpush3.bf16.msra.mxu1 %v1483_v26 }
 0x286   :  { %1538 = vmatpush3.bf16.msra.mxu0 %v1843_v50  ;;  %1488 = vmatprep.subr.bf16.mxu1 %v1487_v31 }
 0x289   :  { %1438 = vmatmul.mubr.f32.vlgmr.msra.gmra.mrb[0].mxu0 %v1871_v13  ;;  %1490 = vmatpush3.bf16.msra.mxu1 %v1487_v31 }
 0x28a   :  { %1440 = vmatprep.mubr.f32.mxu0 %v1887_v32 }
 0x28c   :  { %1372 = vmatmul.mubr.f32.vlgmr.msra.gmra.mrb[0].mxu1 %v1882_v21 }
 0x28d   :  { %1441 = vmatmul.mubr.f32.gmra.mrb[2].mxu0 %v1899_v38  ;;  %1374 = vmatprep.mubr.f32.mxu1 %v1893_v36 }
 0x290   :  { %1375 = vmatmul.mubr.f32.gmra.mrb[2].mxu1 %v1904_v30 }
 0x35c   :  { %v1439_v18 = vpop.f32.mrb[0].mxu0 }
 0x35d   :  { %v1030_v11 = vpop.f32.mrb[1].mxu0 }
 0x35f   :  { %v1373_v45 = vpop.f32.mrb[0].mxu1 }
 0x360   :  { %v1943_v54 = vadd.f32 %v1439_v18, %v1373_v45  ;;  %v1442_v50 = vpop.f32.mrb[2].mxu0  ;;  %v712_v55 = vpop.f32.mrb[1].mxu1 }
 0x361   :  { %v1945_v57 = vadd.f32 %v1030_v11, %v712_v55  ;;  %v1042_v61 = vpop.f32.mrb[3].mxu0 }
 0x362   :  { %v1055_v9 = vsel %vm75_vm0, %v1943_v54, 0.0  ;;  %v1069_v19 = vmul.f32 %v1943_v54, %v1943_v54 }
 0x363   :  { %1056 = vadd.xlane.f32.xlu1 %v1055_v9  ;;  %v1376_v6 = vpop.f32.mrb[2].mxu1  ;;  %v1052_v14 = vsel %vm75_vm0, %v1945_v57, 0.0  ;;  %v1068_v58 = vmul.f32 %v1945_v57, %v1945_v57  ;;  %v1639_v9 = vmov 37  }
 0x364   :  { %v1949_v13 = vadd.f32 %v1442_v50, %v1376_v6  ;;  %v726_v8 = vpop.f32.mrb[3].mxu1  ;;  %v1075_v21 = vsel %vm75_vm0, %v1069_v19, 0.0 }
 0x365   :  { %v1951_v7 = vadd.f32 %v1042_v61, %v726_v8  ;;  %v1072_v25 = vsel %vm75_vm0, %v1068_v58, 0.0  ;;  %v1606_v8 = vld [vmem:[%s2012_s1] sm:$0xff] }
 0x366   :  { %v1071_v15 = vmul.f32 %v1949_v13, %v1949_v13  ;;  %v1061_v12 = vsel %vm75_vm0, %v1949_v13, 0.0 }
 0x367   :  { %1053 = vadd.xlane.f32.xlu1 %v1052_v14  ;;  %v1058_v17 = vsel %vm75_vm0, %v1951_v7, 0.0  ;;  %v1070_v32 = vmul.f32 %v1951_v7, %v1951_v7 }
 0x368   :  { %v1081_v20 = vsel %vm75_vm0, %v1071_v15, 0.0  ;;  %v1640_v15 = vmov 38  }
 0x369   :  { %1082 = vadd.xlane.f32.xlu0 %v1081_v20  ;;  %v1078_v33 = vsel %vm75_vm0, %v1070_v32, 0.0 }
 0x36b   :  { %1076 = vadd.xlane.f32.xlu1 %v1075_v21 }
 0x36f   :  { %1073 = vadd.xlane.f32.xlu1 %v1072_v25 }
 0x373   :  { %1062 = vadd.xlane.f32.xlu1 %v1061_v12 }
 0x377   :  { %1059 = vadd.xlane.f32.xlu1 %v1058_v17 }
 0x37b   :  { %1079 = vadd.xlane.f32.xlu1 %v1078_v33 }
 0x3f0   :  { %v1057_v34 = vpop.xlane.xlu1 %1056 }
 0x3f1   :  { %v1065_v63 = vmul.f32 0.1, %v1057_v34 }
 0x3f3   :  { %v1089_v24 = vmul.f32 %v1065_v63, %v1065_v63 }
 0x3f4   :  { %v1054_v59 = vpop.xlane.xlu1 %1053 }
 0x3f5   :  { %v1064_v36 = vmul.f32 0.1, %v1054_v59 }
 0x3f6   :  { %v1083_v41 = vpop.xlane.xlu0 %1082 }
 0x3f7   :  { %v1088_v27 = vmul.f32 %v1064_v36, %v1064_v36  ;;  %v1087_v44 = vmul.f32 0.1, %v1083_v41 }
 0x3f8   :  { %v1077_v35 = vpop.xlane.xlu1 %1076 }
 0x3f9   :  { %v1085_v23 = vmul.f32 0.1, %v1077_v35 }
 0x3fb   :  { %v1093_v37 = vsub.f32 %v1085_v23, %v1089_v24 }
 0x3fc   :  { %v1074_v22 = vpop.xlane.xlu1 %1073 }
 0x3fd   :  { %v1097_v28 = vadd.f32 1e-05, %v1093_v37  ;;  %v1084_v38 = vmul.f32 0.1, %v1074_v22 }
 0x3ff   :  { %1598 = vrsqrt.f32 %v1097_v28  ;;  %v1092_v39 = vsub.f32 %v1084_v38, %v1088_v27 }
 0x400   :  { %v1063_v40 = vpop.xlane.xlu1 %1062 }
 0x401   :  { %v1096_v42 = vadd.f32 1e-05, %v1092_v39  ;;  %v1067_v43 = vmul.f32 0.1, %v1063_v40 }
 0x403   :  { %1600 = vrsqrt.f32 %v1096_v42  ;;  %v1091_v30 = vmul.f32 %v1067_v43, %v1067_v43 }
 0x404   :  { %v1060_v46 = vpop.xlane.xlu1 %1059 }
 0x405   :  { %v1066_v47 = vmul.f32 0.1, %v1060_v46  ;;  %v1095_v48 = vsub.f32 %v1087_v44, %v1091_v30 }
 0x407   :  { %v1090_v53 = vmul.f32 %v1066_v47, %v1066_v47  ;;  %v1099_v60 = vadd.f32 1e-05, %v1095_v48 }
 0x408   :  { %v1080_v49 = vpop.xlane.xlu1 %1079 }
 0x409   :  { %v1599_v51 = vpop.eup %1598  ;;  %v1086_v56 = vmul.f32 0.1, %v1080_v49  ;;  %1602 = vrsqrt.f32 %v1099_v60 }
 0x40a   :  { %v1105_v62 = vmul.f32 %v1599_v51, %v1677_v4 }
 0x40b   :  { %v1094_v2 = vsub.f32 %v1086_v56, %v1090_v53 }
 0x40c   :  { %v1109_v52 = vmul.f32 %v1105_v62, %v1065_v63 }
 0x40d   :  { %v1601_v10 = vpop.eup %1600  ;;  %v1098_v5 = vadd.f32 1e-05, %v1094_v2 }
 0x40e   :  { %1118 = vrot.lane.b32.xlu1 %v1109_v52, %s1635_s0  ;;  %v1104_v26 = vmul.f32 %v1601_v10, %v1665_v1 }
 0x40f   :  { %1604 = vrsqrt.f32 %v1098_v5 }
 0x410   :  { %v1108_v31 = vmul.f32 %v1104_v26, %v1064_v36 }
 0x412   :  { %1116 = vrot.lane.b32.xlu1 %v1108_v31, %s1635_s0 }
 0x413   :  { %v1603_v18 = vpop.eup %1602 }
 0x414   :  { %v1107_v50 = vmul.f32 %v1603_v18, %v1672_v3 }
 0x416   :  { %v1111_v61 = vmul.f32 %v1107_v50, %v1067_v43 }
 0x419   :  { %v1605_v11 = vpop.eup %1604 }
 0x41a   :  { %v1106_v45 = vmul.f32 %v1605_v11, %v1660_v0 }
 0x41c   :  { %v1110_v55 = vmul.f32 %v1106_v45, %v1066_v47 }
 0x41e   :  { %1120 = vrot.lane.b32.xlu1 %v1110_v55, %s1635_s0 }
 0x422   :  { %1122 = vrot.lane.b32.xlu1 %v1111_v61, %s1635_s0 }
 0x426   :  { %1134 = vperm.xlu1 %1575, %v1104_v26  }
 0x42a   :  { %1139 = vperm.xlu1 %1575, %v1105_v62  }
 0x42e   :  { %1144 = vperm.xlu1 %1575, %v1106_v45  }
 0x432   :  { %1149 = vperm.xlu1 %1575, %v1107_v50  }
 0x436   :  { %1577 = vset.pattern.permute.xlu1 %v1639_v9 }
 0x437   :  { %1185 = vperm.xlu1 %1577, %v1665_v1   ;;  %v1607_v1 = vld [vmem:[%s2012_s1 + $0x18] sm:$0xff] }
 0x43b   :  { %1189 = vperm.xlu1 %1577, %v1677_v4  }
 0x43f   :  { %1578 = vset.pattern.permute.xlu1 %v1638_v29 }
 0x480   :  { %v1119_v0 = vpop.permute.xlu1 %1118 }
 0x481   :  { %v1129_v3 = vsub.f32 %v1677_v4, %v1119_v0  ;;  %v1608_v4 = vld [vmem:[%s2012_s1 + $0x10] sm:$0xff]  ;;  %s1641_s1 = smov [#allocation2]  }
 0x482   :  { %s1230_s5 = sshll.u32 %s1641_s1, 4  ;;  %s1231_s5 = int_to_ptr.vmem [resolvable:$true] %s1230_s5 }
 0x483   :  { %1163 = vperm.xlu0 %1576, %v1129_v3   ;;  %s1609_s6 = scalar_lea.vmem %s1231_s5, 16  ;;  %s1613_s7 = scalar_lea.vmem %s1231_s5, 32 }
 0x484   :  { %v1117_v6 = vpop.permute.xlu1 %1116  ;;  %p1610_p0 = scmp.ne.s32.totalorder %s1231_s5, %s1609_s6  ;;  %p1614_p1 = scmp.lt.s32.totalorder %s1231_s5, %s1231_s5 }
 0x485   :  { %v1128_v14 = vsub.f32 %v1606_v8, %v1117_v6  ;;  %p1615_p2 = scmp.lt.s32.totalorder %s1613_s7, %s1609_s6 }
 0x487   :  { %1158 = vperm.xlu1 %1578, %v1128_v14   ;;  %1581 = vset.pattern.permute.xlu0 %v1640_v15  ;;  %p1616_p3 = por %p1615_p2, %p1614_p1 }
 0x489   :  { %p1617_p4 = pnand %p1616_p3, %p1610_p0 }
 0x490   :  { %v1121_v19 = vpop.permute.xlu1 %1120 }
 0x491   :  { %v1130_v58 = vsub.f32 %v1608_v4, %v1121_v19 }
 0x494   :  { %v1123_v20 = vpop.permute.xlu1 %1122 }
 0x495   :  { %v1131_v21 = vsub.f32 %v1607_v1, %v1123_v20 }
 0x497   :  { %1173 = vperm.xlu1 %1578, %v1131_v21  }
 0x49b   :  { %1168 = vperm.xlu1 %1578, %v1130_v58  }
 0x49f   :  { %1579 = vset.pattern.permute.xlu1 %v1639_v9 }
 0x4a0   :  { %1193 = vperm.xlu1 %1579, %v1608_v4  }
 0x4a4   :  { %1197 = vperm.xlu1 %1579, %v1607_v1  }
 0x4a5   :  { %v1135_v25 = vpop.permute.xlu1 %1134 }
 0x4a6   :  { %v1152_v59 = vmul.f32 %v1945_v57, %v1135_v25 }
 0x4a8   :  { %1580 = vset.pattern.permute.xlu1 %v1640_v15 }
 0x4a9   :  { %1218 = vperm.xlu1 %1580, %v1606_v8   ;;  %v1140_v12 = vpop.permute.xlu1 %1139 }
 0x4aa   :  { %v1153_v35 = vmul.f32 %v1943_v54, %v1140_v12 }
 0x4ad   :  { %v1145_v17 = vpop.permute.xlu1 %1144 }
 0x4ae   :  { %v1154_v22 = vmul.f32 %v1951_v7, %v1145_v17 }
 0x4b1   :  { %v1150_v32 = vpop.permute.xlu1 %1149 }
 0x4b2   :  { %v1155_v39 = vmul.f32 %v1949_v13, %v1150_v32 }
 0x4b6   :  { %v1186_v33 = vpop.permute.xlu1 %1185 }
 0x4ba   :  { %v1190_v16 = vpop.permute.xlu1 %1189 }
 0x502   :  { %v1164_v63 = vpop.permute.xlu0 %1163 }
 0x503   :  { %v1177_v36 = vadd.f32 %v1164_v63, %v1153_v35 }
 0x505   :  { %v1181_v27 = vmax.f32 %v1177_v36, 0.0 }
 0x506   :  { %v1159_v34 = vpop.permute.xlu1 %1158 }
 0x507   :  { %v1176_v24 = vadd.f32 %v1159_v34, %v1152_v59  ;;  %v1201_v42 = vmul.f32 %v1190_v16, %v1181_v27 }
 0x509   :  { %v1180_v37 = vmax.f32 %v1176_v24, 0.0  ;;  %v1205_v54 = vsel %vm75_vm0, %v1201_v42, 0.0 }
 0x50b   :  { %v1200_v40 = vmul.f32 %v1186_v33, %v1180_v37 }
 0x50d   :  { %v1204_v57 = vsel %vm75_vm0, %v1200_v40, 0.0 }
 0x50e   :  { %v1206_v47 = vadd.f32 %v1205_v54, %v1204_v57 }
 0x516   :  { %v1174_v23 = vpop.permute.xlu1 %1173 }
 0x517   :  { %v1179_v43 = vadd.f32 %v1174_v23, %v1155_v39 }
 0x519   :  { %v1183_v44 = vmax.f32 %v1179_v43, 0.0 }
 0x51a   :  { %v1169_v28 = vpop.permute.xlu1 %1168 }
 0x51b   :  { %v1178_v38 = vadd.f32 %v1169_v28, %v1154_v22 }
 0x51d   :  { %v1182_v41 = vmax.f32 %v1178_v38, 0.0 }
 0x51f   :  { %v1194_v29 = vpop.permute.xlu1 %1193 }
 0x520   :  { %v1202_v30 = vmul.f32 %v1194_v29, %v1182_v41 }
 0x522   :  { %v1207_v46 = vsel %vm75_vm0, %v1202_v30, 0.0 }
 0x523   :  { %v1198_v7 = vpop.permute.xlu1 %1197  ;;  %v1208_v49 = vadd.f32 %v1207_v46, %v1206_v47 }
 0x524   :  { %v1203_v48 = vmul.f32 %v1198_v7, %v1183_v44 }
 0x526   :  { %v1209_v51 = vsel %vm75_vm0, %v1203_v48, 0.0 }
 0x527   :  { %v1210_v13 = vadd.f32 %v1209_v51, %v1208_v49 }
 0x528   :  { %v1219_v52 = vpop.permute.xlu1 %1218 }
 0x529   :  { %v1211_v53 = vrot.slane %v1210_v13, 4 }
 0x52b   :  { %v1212_v56 = vadd.f32 %v1211_v53, %v1210_v13 }
 0x52d   :  { %v1213_v60 = vrot.slane %v1212_v56, 2 }
 0x52f   :  { %v1214_v62 = vadd.f32 %v1213_v60, %v1212_v56 }
 0x531   :  { %v1215_v2 = vrot.slane %v1214_v62, 1 }
 0x533   :  { %v1216_v10 = vadd.f32 %v1215_v2, %v1214_v62 }
 0x535   :  { %v1221_v5 = vadd.f32 %v1219_v52, %v1216_v10 }
 0x537   :  { %1223 = vst.msk [vmem:[#allocation2] sm:$0x1] %vm1222_vm2, %v1221_v5 }
 0x538   :  { %1620 = shalt.err (!%p1617_p4)
}
 0x539   :  { %s1621_s10 = scalar_lea.hbm %s2013_s2, 16 }
 0x53a   :  { %p1622_p5 = scmp.ne.s32.totalorder %s2013_s2, %s1621_s10  ;;  %p1625_p6 = scmp.lt.u32.totalorder %s1621_s10, %s2013_s2 }
 0x53c   :  { %p1627_p7 = pnand %p1625_p6, %p1622_p5 }
 0x53e   :  { %1630 = shalt.err (!%p1627_p7)
}
 0x53f   :  { %1233 = dma.vmem_to_hbm [thread:$0]  %s1231_s5, 16, %s2013_s2, [#allocation3]  }
 0x540   :  { %1631 = dma.done.wait [#allocation3], 16  }
 0x541   :  { %1632 = vsyncadd [#allocation3], 4294967280 }
 0x542   :  { %1237 = vsyncpa [#allocation3], 1 }

</bundles_post_ra>
